<compile_context>
chip_gen: v7x
topology: tpu7x:2x2x1
jax: 0.10.0
libtpu: 0.0.40
codegen_flags: <defaults>
</compile_context>

<pallas_src>
import jax
import jax.numpy as jnp
from jax.experimental import pallas as pl
from jax.experimental.pallas import tpu as pltpu

_LANE = 128
_SUBLANE = 8
_MAX_PACKED_TILE = 256          # packed rows / grid step (= 256*G batch rows)
_MAX_BLOCKDIAG_BYTES = 8 << 20  # cap on the expanded block-diag l1 weight


def _round_up(n: int, m: int) -> int:
    return ((n + m - 1) // m) * m


def _cdiv(a: int, b: int) -> int:
    return -(-a // b)


def _block_diag(w, g):
    """(in, out) -> (g*in, g*out) block-diagonal with g copies of w."""
    i, o = w.shape
    eye = jnp.eye(g, dtype=w.dtype)
    return (eye[:, None, :, None] * w[None, :, None, :]).reshape(g * i, g * o)


def _mlp_kernel(x_ref, w1_ref, b1_ref, w2_ref, b2_ref, o_ref):
    # Two matmuls + bias + sigmoid on the current (packed) batch tile.
    # Weights are whole-array VMEM-resident across all grid steps.
    x = x_ref[...]
    h = jnp.dot(x, w1_ref[...], preferred_element_type=jnp.float32) + b1_ref[...]
    h = jax.nn.sigmoid(h)
    y = jnp.dot(h, w2_ref[...], preferred_element_type=jnp.float32) + b2_ref[...]
    o_ref[...] = y.astype(o_ref.dtype)


def frozen_model_forward(x, w1, b1, w2, b2, *, batch_tile=None):
    """Forward pass:  sigmoid(x @ w1 + b1) @ w2 + b2.

    x : (B, obs)        w1: (obs, hidden)   b1: (1, hidden)
    w2: (hidden, act)   b2: (1, act)        -> out: (B, act) float32
    Weights are stored pre-transposed (in_features, out_features).
    """
    batch, obs = x.shape
    hidden = w1.shape[1]
    act = w2.shape[1]

    # ---- Pack factor: G batch rows per lane-dense packed row (G*act lanes).
    g = max(1, _LANE // act) if act <= _LANE else 1
    while g > 1 and (g * obs) * (g * hidden) * 4 > _MAX_BLOCKDIAG_BYTES:
        g //= 2

    # ---- Tiling in packed rows (second-to-last dim must be a multiple of 8).
    bp_min = _round_up(_cdiv(batch, g), _SUBLANE)
    if batch_tile is not None:
        # User tile is in batch rows; force it to legal granularity.
        t_pack = max(_SUBLANE, _round_up(int(batch_tile), g * _SUBLANE) // g)
        t_pack = min(t_pack, max(_SUBLANE, _round_up(bp_min, _SUBLANE)))
    elif bp_min <= _SUBLANE:
        t_pack = _SUBLANE
    else:
        # >= 2 grid steps (dual-TC on v7x), capped at a large overhead-amortizing tile.
        t_pack = min(_MAX_PACKED_TILE, _round_up(_cdiv(bp_min, 2), _SUBLANE))
    bp_pad = _round_up(bp_min, t_pack)
    batch_p = bp_pad * g
    grid = (bp_pad // t_pack,)

    # ---- Pad batch and pack rows along lanes (free row-major metadata reshape).
    if batch_p != batch:
        x = jnp.pad(x, ((0, batch_p - batch), (0, 0)))
    x_packed = x.reshape(bp_pad, g * obs)

    # ---- Block-diagonal packed weights / tiled biases (mathematically exact:
    # off-diagonal blocks are zero, so each packed slot is an independent row).
    w1p = _block_diag(w1, g)
    b1p = jnp.tile(b1, (1, g))
    w2p = _block_diag(w2, g)
    b2p = jnp.tile(b2, (1, g))

    flops = 2 * bp_pad * (g * obs) * (g * hidden) + 2 * bp_pad * (g * hidden) * (g * act)
    bytes_accessed = 4 * (
        bp_pad * g * obs
        + w1p.size + b1p.size + w2p.size + b2p.size
        + bp_pad * g * act
    )

    # Whole-array, VMEM-resident operands (no block-index codegen, loaded once).
    resident = pl.BlockSpec(memory_space=pltpu.MemorySpace.VMEM)

    out_packed = pl.pallas_call(
        _mlp_kernel,
        out_shape=jax.ShapeDtypeStruct((bp_pad, g * act), jnp.float32),
        grid=grid,
        in_specs=[
            pl.BlockSpec((t_pack, g * obs), lambda i: (i, 0)),  # packed x tile
            resident,  # w1 (block-diag)
            resident,  # b1 (tiled)
            resident,  # w2 (block-diag)
            resident,  # b2 (tiled)
        ],
        out_specs=pl.BlockSpec((t_pack, g * act), lambda i: (i, 0)),
        compiler_params=pltpu.CompilerParams(
            dimension_semantics=("parallel",),
        ),
        cost_estimate=pl.CostEstimate(
            flops=flops,
            transcendentals=batch_p * hidden,
            bytes_accessed=bytes_accessed,
        ),
    )(x_packed, w1p, b1p, w2p, b2p)

    # Unpack (free reshape) and strip batch padding outside the kernel.
    return out_packed.reshape(batch_p, act)[:batch]


def init_params(key, obs_size, act_size):
    """Mimics PyTorch nn.Linear default init (U[-1/sqrt(fan_in), +1/sqrt(fan_in)])."""
    k1, k2, k3, k4 = jax.random.split(key, 4)
    bound1 = 1.0 / jnp.sqrt(obs_size)
    bound2 = 1.0 / jnp.sqrt(obs_size)  # hidden_size == obs_size
    w1 = jax.random.uniform(k1, (obs_size, obs_size), jnp.float32, -bound1, bound1)
    b1 = jax.random.uniform(k2, (1, obs_size), jnp.float32, -bound1, bound1)
    w2 = jax.random.uniform(k3, (obs_size, act_size), jnp.float32, -bound2, bound2)
    b2 = jax.random.uniform(k4, (1, act_size), jnp.float32, -bound2, bound2)
    return w1, b1, w2, b2


def _reference(x, w1, b1, w2, b2):
    return jax.nn.sigmoid(x @ w1 + b1) @ w2 + b2


if __name__ == "__main__":
    # FrozenLake 4x4: 16 states, 4 actions.
    obs_size, act_size = 16, 4
    key = jax.random.PRNGKey(0)
    kx, kx2, kx3, kp = jax.random.split(key, 4)
    w1, b1, w2, b2 = init_params(kp, obs_size, act_size)

    # Case 1: small batch, single grid step.
    batch = 8
    x = jax.random.normal(kx, (batch, obs_size), jnp.float32)
    out = frozen_model_forward(x, w1, b1, w2, b2)
    jax.block_until_ready(out)
    ref = _reference(x, w1, b1, w2, b2)
    assert out.shape == (batch, act_size)
    assert jnp.allclose(out, ref, atol=1e-5, rtol=1e-5)

    # Case 2: larger ragged batch -> multi-step ("parallel") grid + batch padding.
    batch2 = 300
    x2 = jax.random.normal(kx2, (batch2, obs_size), jnp.float32)
    out2 = frozen_model_forward(x2, w1, b1, w2, b2)
    jax.block_until_ready(out2)
    ref2 = _reference(x2, w1, b1, w2, b2)
    assert out2.shape == (batch2, act_size)
    assert jnp.allclose(out2, ref2, atol=1e-5, rtol=1e-5)

    # Case 3: caller-supplied (illegal, non-multiple-of-8) batch_tile is
    # rounded up to a legal granularity instead of failing.
    batch3 = 10
    x3 = jax.random.normal(kx3, (batch3, obs_size), jnp.float32)
    out3 = frozen_model_forward(x3, w1, b1, w2, b2, batch_tile=10)
    jax.block_until_ready(out3)
    ref3 = _reference(x3, w1, b1, w2, b2)
    assert out3.shape == (batch3, act_size)
    assert jnp.allclose(out3, ref3, atol=1e-5, rtol=1e-5)

    print("KERNEL_OK")
</pallas_src>

<mosaic_0001>
module attributes {stable_mosaic.version = 11 : i64} {
  func.func @_mlp_kernel(%arg0: i32, %arg1: memref<8x512xf32, #tpu.memory_space<vmem>>, %arg2: memref<512x512xf32, #tpu.memory_space<vmem>>, %arg3: memref<1x512xf32, #tpu.memory_space<vmem>>, %arg4: memref<512x128xf32, #tpu.memory_space<vmem>>, %arg5: memref<1x128xf32, #tpu.memory_space<vmem>>, %arg6: memref<8x128xf32, #tpu.memory_space<vmem>>) attributes {dimension_semantics = [#tpu.dimension_semantics<parallel>], iteration_bounds = array<i64: 1>, scalar_prefetch = 0 : i64, scratch_operands = 0 : i64, tpu.core_type = #tpu.core_type<tc>, window_params = [{transform_indices = @transform_0, window_bounds = array<i64: 8, 512>}, {pipeline_mode = #tpu.pipeline_mode<synchronous>, transform_indices = @transform_1, window_bounds = array<i64: 512, 512>}, {pipeline_mode = #tpu.pipeline_mode<synchronous>, transform_indices = @transform_2, window_bounds = array<i64: 1, 512>}, {pipeline_mode = #tpu.pipeline_mode<synchronous>, transform_indices = @transform_3, window_bounds = array<i64: 512, 128>}, {pipeline_mode = #tpu.pipeline_mode<synchronous>, transform_indices = @transform_4, window_bounds = array<i64: 1, 128>}, {transform_indices = @transform_5, window_bounds = array<i64: 8, 128>}]} {
    %c0 = arith.constant 0 : index
    %c0_0 = arith.constant 0 : index
    %0 = vector.load %arg1[%c0, %c0_0] : memref<8x512xf32, #tpu.memory_space<vmem>>, vector<8x512xf32>
    %c0_1 = arith.constant 0 : index
    %c0_2 = arith.constant 0 : index
    %1 = vector.load %arg2[%c0_1, %c0_2] : memref<512x512xf32, #tpu.memory_space<vmem>>, vector<512x512xf32>
    %cst = arith.constant dense<0.000000e+00> : vector<8x512xf32>
    %2 = tpu.matmul %0, %1, %cst {dimension_numbers = #tpu.dot_dimension_numbers<[1], [0], [0], [1], [0, 0, 1, 1], [], []>} : vector<8x512xf32>, vector<512x512xf32>, vector<8x512xf32> -> vector<8x512xf32>
    %c0_3 = arith.constant 0 : index
    %c0_4 = arith.constant 0 : index
    %3 = vector.load %arg3[%c0_3, %c0_4] : memref<1x512xf32, #tpu.memory_space<vmem>>, vector<1x512xf32>
    %4 = vector.broadcast %3 : vector<1x512xf32> to vector<8x512xf32>
    %5 = arith.addf %2, %4 : vector<8x512xf32>
    %6 = arith.negf %5 : vector<8x512xf32>
    %7 = math.exp %6 : vector<8x512xf32>
    %cst_5 = arith.constant 1.000000e+00 : f32
    %8 = vector.broadcast %cst_5 : f32 to vector<8x512xf32>
    %9 = arith.addf %8, %7 : vector<8x512xf32>
    %10 = arith.divf %8, %9 : vector<8x512xf32>
    %c0_6 = arith.constant 0 : index
    %c0_7 = arith.constant 0 : index
    %11 = vector.load %arg4[%c0_6, %c0_7] : memref<512x128xf32, #tpu.memory_space<vmem>>, vector<512x128xf32>
    %cst_8 = arith.constant dense<0.000000e+00> : vector<8x128xf32>
    %12 = tpu.matmul %10, %11, %cst_8 {dimension_numbers = #tpu.dot_dimension_numbers<[1], [0], [0], [1], [0, 0, 1, 1], [], []>} : vector<8x512xf32>, vector<512x128xf32>, vector<8x128xf32> -> vector<8x128xf32>
    %c0_9 = arith.constant 0 : index
    %c0_10 = arith.constant 0 : index
    %13 = vector.load %arg5[%c0_9, %c0_10] : memref<1x128xf32, #tpu.memory_space<vmem>>, vector<1x128xf32>
    %14 = vector.broadcast %13 : vector<1x128xf32> to vector<8x128xf32>
    %15 = arith.addf %12, %14 : vector<8x128xf32>
    %c0_11 = arith.constant 0 : index
    %c0_12 = arith.constant 0 : index
    %16 = vector.load %arg6[%c0_11, %c0_12] : memref<8x128xf32, #tpu.memory_space<vmem>>, vector<8x128xf32>
    tpu.vector_store %arg6[%c0_11, %c0_12], %15 {strides = array<i32>} : memref<8x128xf32, #tpu.memory_space<vmem>>, vector<8x128xf32>,
    return
  }
  func.func @transform_0(%arg0: i32) -> (i32, i32) {
    %c0_i32 = arith.constant 0 : i32
    %c0_i32_0 = arith.constant 0 : i32
    return %arg0, %c0_i32 : i32, i32
  }
  func.func @transform_1(%arg0: i32) -> (i32, i32) {
    %c0_i32 = arith.constant 0 : i32
    %c0_i32_0 = arith.constant 0 : i32
    %c0_i32_1 = arith.constant 0 : i32
    return %c0_i32, %c0_i32_0 : i32, i32
  }
  func.func @transform_2(%arg0: i32) -> (i32, i32) {
    %c0_i32 = arith.constant 0 : i32
    %c0_i32_0 = arith.constant 0 : i32
    %c0_i32_1 = arith.constant 0 : i32
    return %c0_i32, %c0_i32_0 : i32, i32
  }
  func.func @transform_3(%arg0: i32) -> (i32, i32) {
    %c0_i32 = arith.constant 0 : i32
    %c0_i32_0 = arith.constant 0 : i32
    %c0_i32_1 = arith.constant 0 : i32
    return %c0_i32, %c0_i32_0 : i32, i32
  }
  func.func @transform_4(%arg0: i32) -> (i32, i32) {
    %c0_i32 = arith.constant 0 : i32
    %c0_i32_0 = arith.constant 0 : i32
    %c0_i32_1 = arith.constant 0 : i32
    return %c0_i32, %c0_i32_0 : i32, i32
  }
  func.func @transform_5(%arg0: i32) -> (i32, i32) {
    %c0_i32 = arith.constant 0 : i32
    %c0_i32_0 = arith.constant 0 : i32
    return %arg0, %c0_i32 : i32, i32
  }
}

</mosaic_0001>

<bundles_post_ra>
// kernel: tpu_custom_call.1
= control target key start
LH: loop header
LB: loop body
LE: loop exit
PB: predicated region body
PF: predicated region fallthrough
CT: control target
= control target key end

     0   :  { %10 = vsyncpa [#allocation3], 0  ;;  %s1491_s0 = inlined_call_operand.hbm [shape: f32[8,512], index: 0, kind: input, shape index: {}]   ;;  %s1492_s1 = inlined_call_operand.hbm [shape: f32[512,512], index: 1, kind: input, shape index: {}]   ;;  %s1493_s2 = inlined_call_operand.vmem [shape: f32[1,512], index: 2, kind: input, shape index: {}]   ;;  %s1494_s3 = inlined_call_operand.hbm [shape: f32[512,128], index: 3, kind: input, shape index: {}]   ;;  %s1495_s4 = inlined_call_operand.vmem [shape: f32[1,128], index: 4, kind: input, shape index: {}]   ;;  %s1496_s5 = inlined_call_operand.hbm [shape: f32[8,128], index: 5, kind: output, shape index: {}]  }
   0x1   :  { %11 = vsyncpa [#allocation6], 0 }
   0x2   :  { %12 = vsyncpa [#allocation4], 0  ;;  %s1399_s18 = smov [#allocation5]   ;;  %s1305_s22 = scalar_lea.hbm %s1492_s1, 32768 }
   0x3   :  { %s28_s19 = sshll.u32 %s1399_s18, 4  ;;  %p1306_p0 = scmp.ne.s32.totalorder %s1492_s1, %s1305_s22  ;;  %s29_s19 = int_to_ptr.vmem [resolvable:$true] %s28_s19 }
   0x4   :  { %p1309_p1 = scmp.lt.u32.totalorder %s1305_s22, %s1492_s1 }
   0x6   :  { %p1311_p2 = pnand %p1309_p1, %p1306_p0 }
   0x8   :  { %1314 = shalt.err (!%p1311_p2)
}
   0x9   :  { %s1315_s27 = scalar_lea.vmem %s29_s19, 32768  ;;  %p1320_p4 = scmp.lt.s32.totalorder %s29_s19, %s29_s19 }
   0xa   :  { %p1316_p3 = scmp.ne.s32.totalorder %s29_s19, %s1315_s27  ;;  %p1321_p5 = scmp.lt.s32.totalorder %s1315_s27, %s1315_s27 }
   0xc   :  { %p1322_p6 = por %p1321_p5, %p1320_p4 }
   0xe   :  { %p1323_p7 = pnand %p1322_p6, %p1316_p3 }
  0x10   :  { %1326 = shalt.err (!%p1323_p7)
}
  0x11   :  { %s1400_s28 = smov 512   ;;  %s1401_s29 = smov 32  }
  0x12   :  { %34 = dma.hbm_to_vmem [thread:$0]  %s1492_s1, 32768, %s29_s19, [#allocation6], %s1400_s28, %s1400_s28, %s1401_s29  }
  0x13   :  { %s1402_s7 = smov [#allocation2]   ;;  %s1403_s9 = smov [#allocation7]  }
  0x14   :  { %s19_s8 = sshll.u32 %s1402_s7, 4  ;;  %s42_s10 = sshll.u32 %s1403_s9, 4  ;;  %s20_s8 = int_to_ptr.vmem [resolvable:$true] %s19_s8  ;;  %s43_s10 = int_to_ptr.vmem [resolvable:$true] %s42_s10 }
  0x15   :  { %s1327_s13 = scalar_lea.hbm %s1491_s0, 512 }
  0x16   :  { %p1328_p8 = scmp.ne.s32.totalorder %s1491_s0, %s1327_s13  ;;  %p1331_p9 = scmp.lt.u32.totalorder %s1327_s13, %s1491_s0 }
  0x18   :  { %p1333_p10 = pnand %p1331_p9, %p1328_p8 }
  0x1a   :  { %1336 = shalt.err (!%p1333_p10)
}
  0x1b   :  { %s1337_s1 = scalar_lea.vmem %s20_s8, 512  ;;  %p1342_p12 = scmp.lt.s32.totalorder %s20_s8, %s20_s8 }
  0x1c   :  { %p1338_p11 = scmp.ne.s32.totalorder %s20_s8, %s1337_s1  ;;  %p1343_p13 = scmp.lt.s32.totalorder %s1337_s1, %s1337_s1 }
  0x1e   :  { %p1344_p0 = por %p1343_p13, %p1342_p12 }
  0x20   :  { %p1345_p1 = pnand %p1344_p0, %p1338_p11 }
  0x22   :  { %1348 = shalt.err (!%p1345_p1)
}
  0x23   :  { %22 = dma.hbm_to_vmem [thread:$0]  %s1491_s0, 512, %s20_s8, [#allocation3]  }
  0x24   :  { %s1349_s22 = scalar_lea.hbm %s1494_s3, 8192 }
  0x25   :  { %p1350_p2 = scmp.ne.s32.totalorder %s1494_s3, %s1349_s22  ;;  %p1353_p3 = scmp.lt.u32.totalorder %s1349_s22, %s1494_s3 }
  0x27   :  { %p1355_p4 = pnand %p1353_p3, %p1350_p2 }
  0x29   :  { %1358 = shalt.err (!%p1355_p4)
}
  0x2a   :  { %s1359_s27 = scalar_lea.vmem %s43_s10, 8192  ;;  %p1364_p6 = scmp.lt.s32.totalorder %s43_s10, %s43_s10 }
  0x2b   :  { %p1360_p5 = scmp.ne.s32.totalorder %s43_s10, %s1359_s27  ;;  %p1365_p7 = scmp.lt.s32.totalorder %s1359_s27, %s1359_s27 }
  0x2d   :  { %p1366_p8 = por %p1365_p7, %p1364_p6 }
  0x2f   :  { %p1367_p9 = pnand %p1366_p8, %p1360_p5 }
  0x31   :  { %1370 = shalt.err (!%p1367_p9)
}
  0x32   :  { %s1404_s0 = smov 128   ;;  %s1405_s28 = smov 8  }
  0x33   :  { %48 = dma.hbm_to_vmem [thread:$0]  %s1494_s3, 8192, %s43_s10, [#allocation6], %s1404_s0, %s1404_s0, %s1405_s28  }
  0x34   :  { %1393 = dma.done.wait [#allocation3], 512  }
  0x35   :  { %1394 = vsyncadd [#allocation3], 4294966784 }
  0x36   :  { %1395 = dma.done.wait [#allocation6], 40960  }
  0x37   :  { %1396 = vsyncadd [#allocation6], 4294926336  ;;  %v65_v0 = vld [vmem:[#allocation5 + $0x8] sm:$0xff]  ;;  %v67_v2 = vld [vmem:[#allocation5 + $0x18] sm:$0xff]  ;;  %s1406_s8 = smov [#allocation8]  }
  0x38   :  { %v69_v1 = vld [vmem:[#allocation5 + $0x28] sm:$0xff]  ;;  %v71_v4 = vld [vmem:[#allocation5 + $0x38] sm:$0xff]  ;;  %v64_v5 = vld [vmem:[#allocation5] sm:$0xff]  ;;  %s868_s9 = sshll.u32 %s1406_s8, 4  ;;  %s869_s9 = int_to_ptr.vmem [resolvable:$true] %s868_s9 }
  0x39   :  { %v953_v3 = vpack.c.bf16 %v69_v1, %v65_v0  ;;  %v68_v6 = vld [vmem:[#allocation5 + $0x20] sm:$0xff]  ;;  %v1081_v7 = vpack.c.bf16 %v71_v4, %v67_v2  ;;  %v66_v9 = vld [vmem:[#allocation5 + $0x10] sm:$0xff]  ;;  %v73_v11 = vld [vmem:[#allocation5 + $0x48] sm:$0xff]  ;;  %s1371_s10 = scalar_lea.vmem %s869_s9, 128  ;;  %p1376_p11 = scmp.lt.s32.totalorder %s869_s9, %s869_s9 }
  0x3a   :  { %v955_v8 = vpack.c.bf16 %v68_v6, %v64_v5  ;;  %v70_v10 = vld [vmem:[#allocation5 + $0x30] sm:$0xff]  ;;  %v77_v13 = vld [vmem:[#allocation5 + $0x68] sm:$0xff]  ;;  %v75_v14 = vld [vmem:[#allocation5 + $0x58] sm:$0xff]  ;;  %p1372_p10 = scmp.ne.s32.totalorder %s869_s9, %s1371_s10  ;;  %p1377_p12 = scmp.lt.s32.totalorder %s1371_s10, %s1371_s10 }
  0x3b   :  { %954 = vmatprep.subr.bf16.mxu0 %v953_v3  ;;  %v1083_v12 = vpack.c.bf16 %v70_v10, %v66_v9  ;;  %v79_v15 = vld [vmem:[#allocation5 + $0x78] sm:$0xff]  ;;  %1082 = vmatprep.subr.bf16.mxu1 %v1081_v7  ;;  %v957_v16 = vpack.c.bf16 %v77_v13, %v73_v11  ;;  %v72_v18 = vld [vmem:[#allocation5 + $0x40] sm:$0xff]  ;;  %v74_v20 = vld [vmem:[#allocation5 + $0x50] sm:$0xff] }
  0x3c   :  { %956 = vmatpush1.bf16.msra.mxu0 %v955_v8  ;;  %v1085_v17 = vpack.c.bf16 %v79_v15, %v75_v14  ;;  %v76_v19 = vld [vmem:[#allocation5 + $0x60] sm:$0xff]  ;;  %v78_v22 = vld [vmem:[#allocation5 + $0x70] sm:$0xff]  ;;  %v81_v23 = vld [vmem:[#allocation5 + $0x88] sm:$0xff]  ;;  %p1378_p13 = por %p1377_p12, %p1376_p11 }
  0x3d   :  { %1084 = vmatpush1.bf16.msra.mxu1 %v1083_v12  ;;  %v959_v21 = vpack.c.bf16 %v76_v19, %v72_v18  ;;  %v85_v24 = vld [vmem:[#allocation5 + $0xa8] sm:$0xff]  ;;  %958 = vmatprep.subr.bf16.mxu0 %v957_v16  ;;  %v1087_v25 = vpack.c.bf16 %v78_v22, %v74_v20  ;;  %v83_v27 = vld [vmem:[#allocation5 + $0x98] sm:$0xff]  ;;  %v80_v29 = vld [vmem:[#allocation5 + $0x80] sm:$0xff] }
  0x3e   :  { %1086 = vmatprep.subr.bf16.mxu1 %v1085_v17  ;;  %v961_v26 = vpack.c.bf16 %v85_v24, %v81_v23  ;;  %v87_v28 = vld [vmem:[#allocation5 + $0xb8] sm:$0xff]  ;;  %v84_v31 = vld [vmem:[#allocation5 + $0xa0] sm:$0xff]  ;;  %v82_v32 = vld [vmem:[#allocation5 + $0x90] sm:$0xff]  ;;  %p1379_p0 = pnand %p1378_p13, %p1372_p10 }
  0x3f   :  { %v1089_v30 = vpack.c.bf16 %v87_v28, %v83_v27  ;;  %v86_v33 = vld [vmem:[#allocation5 + $0xb0] sm:$0xff]  ;;  %v963_v34 = vpack.c.bf16 %v84_v31, %v80_v29  ;;  %v89_v35 = vld [vmem:[#allocation5 + $0xc8] sm:$0xff]  ;;  %v91_v37 = vld [vmem:[#allocation5 + $0xd8] sm:$0xff] }
  0x40   :  { %960 = vmatpush1.bf16.msra.mxu0 %v959_v21  ;;  %v93_v36 = vld [vmem:[#allocation5 + $0xe8] sm:$0xff]  ;;  %v1091_v38 = vpack.c.bf16 %v86_v33, %v82_v32  ;;  %v95_v40 = vld [vmem:[#allocation5 + $0xf8] sm:$0xff]  ;;  %v88_v41 = vld [vmem:[#allocation5 + $0xc0] sm:$0xff] }
  0x41   :  { %1088 = vmatpush1.bf16.msra.mxu1 %v1087_v25  ;;  %962 = vmatprep.subr.bf16.mxu0 %v961_v26  ;;  %v965_v39 = vpack.c.bf16 %v93_v36, %v89_v35  ;;  %v92_v42 = vld [vmem:[#allocation5 + $0xe0] sm:$0xff]  ;;  %v1093_v43 = vpack.c.bf16 %v95_v40, %v91_v37  ;;  %v90_v44 = vld [vmem:[#allocation5 + $0xd0] sm:$0xff]  ;;  %v97_v46 = vld [vmem:[#allocation5 + $0x108] sm:$0xff] }
  0x42   :  { %1090 = vmatprep.subr.bf16.mxu1 %v1089_v30  ;;  %v94_v45 = vld [vmem:[#allocation5 + $0xf0] sm:$0xff]  ;;  %v101_v47 = vld [vmem:[#allocation5 + $0x128] sm:$0xff]  ;;  %v99_v48 = vld [vmem:[#allocation5 + $0x118] sm:$0xff]  ;;  %v967_v50 = vpack.c.bf16 %v92_v42, %v88_v41 }
  0x43   :  { %v103_v49 = vld [vmem:[#allocation5 + $0x138] sm:$0xff]  ;;  %v1095_v51 = vpack.c.bf16 %v94_v45, %v90_v44  ;;  %v969_v52 = vpack.c.bf16 %v101_v47, %v97_v46  ;;  %v96_v53 = vld [vmem:[#allocation5 + $0x100] sm:$0xff]  ;;  %v98_v55 = vld [vmem:[#allocation5 + $0x110] sm:$0xff] }
  0x44   :  { %964 = vmatpush1.bf16.msra.mxu0 %v963_v34  ;;  %v100_v54 = vld [vmem:[#allocation5 + $0x120] sm:$0xff]  ;;  %v1097_v56 = vpack.c.bf16 %v103_v49, %v99_v48  ;;  %v102_v57 = vld [vmem:[#allocation5 + $0x130] sm:$0xff]  ;;  %v105_v58 = vld [vmem:[#allocation5 + $0x148] sm:$0xff] }
  0x45   :  { %1092 = vmatpush1.bf16.msra.mxu1 %v1091_v38  ;;  %966 = vmatprep.subr.bf16.mxu0 %v965_v39  ;;  %v109_v59 = vld [vmem:[#allocation5 + $0x168] sm:$0xff]  ;;  %v107_v60 = vld [vmem:[#allocation5 + $0x158] sm:$0xff]  ;;  %v971_v62 = vpack.c.bf16 %v100_v54, %v96_v53  ;;  %v1099_v63 = vpack.c.bf16 %v102_v57, %v98_v55  ;;  %v104_v1 = vld [vmem:[#allocation5 + $0x140] sm:$0xff] }
  0x46   :  { %1094 = vmatprep.subr.bf16.mxu1 %v1093_v43  ;;  %v111_v61 = vld [vmem:[#allocation5 + $0x178] sm:$0xff]  ;;  %v973_v0 = vpack.c.bf16 %v109_v59, %v105_v58  ;;  %v108_v2 = vld [vmem:[#allocation5 + $0x160] sm:$0xff]  ;;  %v106_v3 = vld [vmem:[#allocation5 + $0x150] sm:$0xff] }
  0x47   :  { %v1101_v4 = vpack.c.bf16 %v111_v61, %v107_v60  ;;  %v110_v5 = vld [vmem:[#allocation5 + $0x170] sm:$0xff]  ;;  %v113_v6 = vld [vmem:[#allocation5 + $0x188] sm:$0xff]  ;;  %v115_v8 = vld [vmem:[#allocation5 + $0x198] sm:$0xff]  ;;  %v975_v10 = vpack.c.bf16 %v108_v2, %v104_v1 }
  0x48   :  { %968 = vmatpush1.bf16.msra.mxu0 %v967_v50  ;;  %v117_v7 = vld [vmem:[#allocation5 + $0x1a8] sm:$0xff]  ;;  %v119_v9 = vld [vmem:[#allocation5 + $0x1b8] sm:$0xff]  ;;  %v1103_v11 = vpack.c.bf16 %v110_v5, %v106_v3  ;;  %v112_v13 = vld [vmem:[#allocation5 + $0x180] sm:$0xff] }
  0x49   :  { %1096 = vmatpush1.bf16.msra.mxu1 %v1095_v51  ;;  %970 = vmatprep.subr.bf16.mxu0 %v969_v52  ;;  %v977_v12 = vpack.c.bf16 %v117_v7, %v113_v6  ;;  %v116_v14 = vld [vmem:[#allocation5 + $0x1a0] sm:$0xff]  ;;  %v114_v15 = vld [vmem:[#allocation5 + $0x190] sm:$0xff]  ;;  %v1105_v16 = vpack.c.bf16 %v119_v9, %v115_v8  ;;  %v121_v18 = vld [vmem:[#allocation5 + $0x1c8] sm:$0xff] }
  0x4a   :  { %1098 = vmatprep.subr.bf16.mxu1 %v1097_v56  ;;  %v118_v17 = vld [vmem:[#allocation5 + $0x1b0] sm:$0xff]  ;;  %v125_v19 = vld [vmem:[#allocation5 + $0x1e8] sm:$0xff]  ;;  %v123_v20 = vld [vmem:[#allocation5 + $0x1d8] sm:$0xff]  ;;  %v979_v22 = vpack.c.bf16 %v116_v14, %v112_v13 }
  0x4b   :  { %v127_v21 = vld [vmem:[#allocation5 + $0x1f8] sm:$0xff]  ;;  %v1107_v23 = vpack.c.bf16 %v118_v17, %v114_v15  ;;  %v981_v24 = vpack.c.bf16 %v125_v19, %v121_v18  ;;  %v120_v25 = vld [vmem:[#allocation5 + $0x1c0] sm:$0xff]  ;;  %v122_v27 = vld [vmem:[#allocation5 + $0x1d0] sm:$0xff] }
  0x4c   :  { %972 = vmatpush1.bf16.msra.mxu0 %v971_v62  ;;  %v124_v26 = vld [vmem:[#allocation5 + $0x1e0] sm:$0xff]  ;;  %v1109_v28 = vpack.c.bf16 %v127_v21, %v123_v20  ;;  %v126_v29 = vld [vmem:[#allocation5 + $0x1f0] sm:$0xff]  ;;  %v129_v30 = vld [vmem:[#allocation5 + $0x208] sm:$0xff] }
  0x4d   :  { %1100 = vmatpush1.bf16.msra.mxu1 %v1099_v63  ;;  %974 = vmatprep.subr.bf16.mxu0 %v973_v0  ;;  %v133_v31 = vld [vmem:[#allocation5 + $0x228] sm:$0xff]  ;;  %v131_v32 = vld [vmem:[#allocation5 + $0x218] sm:$0xff]  ;;  %v983_v34 = vpack.c.bf16 %v124_v26, %v120_v25  ;;  %v1111_v35 = vpack.c.bf16 %v126_v29, %v122_v27  ;;  %v128_v37 = vld [vmem:[#allocation5 + $0x200] sm:$0xff] }
  0x4e   :  { %1102 = vmatprep.subr.bf16.mxu1 %v1101_v4  ;;  %v135_v33 = vld [vmem:[#allocation5 + $0x238] sm:$0xff]  ;;  %v985_v36 = vpack.c.bf16 %v133_v31, %v129_v30  ;;  %v132_v38 = vld [vmem:[#allocation5 + $0x220] sm:$0xff]  ;;  %v130_v39 = vld [vmem:[#allocation5 + $0x210] sm:$0xff] }
  0x4f   :  { %v1113_v40 = vpack.c.bf16 %v135_v33, %v131_v32  ;;  %v134_v41 = vld [vmem:[#allocation5 + $0x230] sm:$0xff]  ;;  %v137_v42 = vld [vmem:[#allocation5 + $0x248] sm:$0xff]  ;;  %v139_v44 = vld [vmem:[#allocation5 + $0x258] sm:$0xff]  ;;  %v987_v46 = vpack.c.bf16 %v132_v38, %v128_v37 }
  0x50   :  { %976 = vmatpush1.bf16.msra.mxu0 %v975_v10  ;;  %v141_v43 = vld [vmem:[#allocation5 + $0x268] sm:$0xff]  ;;  %v143_v45 = vld [vmem:[#allocation5 + $0x278] sm:$0xff]  ;;  %v1115_v47 = vpack.c.bf16 %v134_v41, %v130_v39  ;;  %v136_v49 = vld [vmem:[#allocation5 + $0x240] sm:$0xff] }
  0x51   :  { %1104 = vmatpush1.bf16.msra.mxu1 %v1103_v11  ;;  %978 = vmatprep.subr.bf16.mxu0 %v977_v12  ;;  %v989_v48 = vpack.c.bf16 %v141_v43, %v137_v42  ;;  %v140_v50 = vld [vmem:[#allocation5 + $0x260] sm:$0xff]  ;;  %v138_v51 = vld [vmem:[#allocation5 + $0x250] sm:$0xff]  ;;  %v1117_v52 = vpack.c.bf16 %v143_v45, %v139_v44  ;;  %v145_v54 = vld [vmem:[#allocation5 + $0x288] sm:$0xff] }
  0x52   :  { %1106 = vmatprep.subr.bf16.mxu1 %v1105_v16  ;;  %v142_v53 = vld [vmem:[#allocation5 + $0x270] sm:$0xff]  ;;  %v149_v55 = vld [vmem:[#allocation5 + $0x2a8] sm:$0xff]  ;;  %v147_v56 = vld [vmem:[#allocation5 + $0x298] sm:$0xff]  ;;  %v991_v58 = vpack.c.bf16 %v140_v50, %v136_v49 }
  0x53   :  { %v151_v57 = vld [vmem:[#allocation5 + $0x2b8] sm:$0xff]  ;;  %v1119_v59 = vpack.c.bf16 %v142_v53, %v138_v51  ;;  %v993_v60 = vpack.c.bf16 %v149_v55, %v145_v54  ;;  %v144_v61 = vld [vmem:[#allocation5 + $0x280] sm:$0xff]  ;;  %v146_v63 = vld [vmem:[#allocation5 + $0x290] sm:$0xff] }
  0x54   :  { %980 = vmatpush1.bf16.msra.mxu0 %v979_v22  ;;  %v148_v62 = vld [vmem:[#allocation5 + $0x2a0] sm:$0xff]  ;;  %v1121_v0 = vpack.c.bf16 %v151_v57, %v147_v56  ;;  %v150_v1 = vld [vmem:[#allocation5 + $0x2b0] sm:$0xff]  ;;  %v153_v2 = vld [vmem:[#allocation5 + $0x2c8] sm:$0xff] }
  0x55   :  { %1108 = vmatpush1.bf16.msra.mxu1 %v1107_v23  ;;  %982 = vmatprep.subr.bf16.mxu0 %v981_v24  ;;  %v157_v3 = vld [vmem:[#allocation5 + $0x2e8] sm:$0xff]  ;;  %v155_v4 = vld [vmem:[#allocation5 + $0x2d8] sm:$0xff]  ;;  %v995_v6 = vpack.c.bf16 %v148_v62, %v144_v61  ;;  %v152_v7 = vld [vmem:[#allocation5 + $0x2c0] sm:$0xff]  ;;  %v1123_v8 = vpack.c.bf16 %v150_v1, %v146_v63 }
  0x56   :  { %1110 = vmatprep.subr.bf16.mxu1 %v1109_v28  ;;  %v159_v5 = vld [vmem:[#allocation5 + $0x2f8] sm:$0xff]  ;;  %v997_v9 = vpack.c.bf16 %v157_v3, %v153_v2  ;;  %v156_v10 = vld [vmem:[#allocation5 + $0x2e0] sm:$0xff]  ;;  %v154_v11 = vld [vmem:[#allocation5 + $0x2d0] sm:$0xff] }
  0x57   :  { %v158_v12 = vld [vmem:[#allocation5 + $0x2f0] sm:$0xff]  ;;  %v1125_v13 = vpack.c.bf16 %v159_v5, %v155_v4  ;;  %v161_v14 = vld [vmem:[#allocation5 + $0x308] sm:$0xff]  ;;  %v163_v17 = vld [vmem:[#allocation5 + $0x318] sm:$0xff]  ;;  %v999_v19 = vpack.c.bf16 %v156_v10, %v152_v7 }
  0x58   :  { %984 = vmatpush1.bf16.msra.mxu0 %v983_v34  ;;  %v165_v15 = vld [vmem:[#allocation5 + $0x328] sm:$0xff]  ;;  %v167_v18 = vld [vmem:[#allocation5 + $0x338] sm:$0xff]  ;;  %v1127_v20 = vpack.c.bf16 %v158_v12, %v154_v11  ;;  %v160_v22 = vld [vmem:[#allocation5 + $0x300] sm:$0xff] }
  0x59   :  { %1112 = vmatpush1.bf16.msra.mxu1 %v1111_v35  ;;  %986 = vmatprep.subr.bf16.mxu0 %v985_v36  ;;  %v61_v16 = vld [vmem:[#allocation2 + $0x8] sm:$0xff]  ;;  %v1001_v21 = vpack.c.bf16 %v165_v15, %v161_v14  ;;  %v164_v23 = vld [vmem:[#allocation5 + $0x320] sm:$0xff]  ;;  %v162_v24 = vld [vmem:[#allocation5 + $0x310] sm:$0xff]  ;;  %v1129_v25 = vpack.c.bf16 %v167_v18, %v163_v17 }
  0x5a   :  { %1114 = vmatprep.subr.bf16.mxu1 %v1113_v40  ;;  %406 = vmatprep.mubr.f32.mxu0 %v61_v16  ;;  %v166_v26 = vld [vmem:[#allocation5 + $0x330] sm:$0xff]  ;;  %v169_v27 = vld [vmem:[#allocation5 + $0x348] sm:$0xff]  ;;  %v171_v29 = vld [vmem:[#allocation5 + $0x358] sm:$0xff]  ;;  %v1003_v31 = vpack.c.bf16 %v164_v23, %v160_v22 }
  0x5b   :  { %548 = vmatprep.mubr.f32.mxu1 %v61_v16  ;;  %v173_v28 = vld [vmem:[#allocation5 + $0x368] sm:$0xff]  ;;  %v175_v30 = vld [vmem:[#allocation5 + $0x378] sm:$0xff]  ;;  %v1131_v32 = vpack.c.bf16 %v166_v26, %v162_v24  ;;  %v168_v34 = vld [vmem:[#allocation5 + $0x340] sm:$0xff] }
  0x5c   :  { %988 = vmatpush1.bf16.msra.mxu0 %v987_v46  ;;  %v1005_v33 = vpack.c.bf16 %v173_v28, %v169_v27  ;;  %v172_v35 = vld [vmem:[#allocation5 + $0x360] sm:$0xff]  ;;  %v170_v36 = vld [vmem:[#allocation5 + $0x350] sm:$0xff]  ;;  %v1133_v37 = vpack.c.bf16 %v175_v30, %v171_v29  ;;  %v177_v39 = vld [vmem:[#allocation5 + $0x388] sm:$0xff] }
  0x5d   :  { %1116 = vmatpush1.bf16.msra.mxu1 %v1115_v47  ;;  %990 = vmatprep.subr.bf16.mxu0 %v989_v48  ;;  %v174_v38 = vld [vmem:[#allocation5 + $0x370] sm:$0xff]  ;;  %v181_v40 = vld [vmem:[#allocation5 + $0x3a8] sm:$0xff]  ;;  %v179_v41 = vld [vmem:[#allocation5 + $0x398] sm:$0xff]  ;;  %v1007_v43 = vpack.c.bf16 %v172_v35, %v168_v34 }
  0x5e   :  { %1118 = vmatprep.subr.bf16.mxu1 %v1117_v52  ;;  %v183_v42 = vld [vmem:[#allocation5 + $0x3b8] sm:$0xff]  ;;  %v1135_v44 = vpack.c.bf16 %v174_v38, %v170_v36  ;;  %v1009_v45 = vpack.c.bf16 %v181_v40, %v177_v39  ;;  %v176_v46 = vld [vmem:[#allocation5 + $0x380] sm:$0xff]  ;;  %v178_v48 = vld [vmem:[#allocation5 + $0x390] sm:$0xff] }
  0x5f   :  { %v180_v47 = vld [vmem:[#allocation5 + $0x3a0] sm:$0xff]  ;;  %v1137_v49 = vpack.c.bf16 %v183_v42, %v179_v41  ;;  %v182_v50 = vld [vmem:[#allocation5 + $0x3b0] sm:$0xff]  ;;  %v185_v51 = vld [vmem:[#allocation5 + $0x3c8] sm:$0xff] }
  0x60   :  { %992 = vmatpush1.bf16.msra.mxu0 %v991_v58  ;;  %v189_v52 = vld [vmem:[#allocation5 + $0x3e8] sm:$0xff]  ;;  %v187_v53 = vld [vmem:[#allocation5 + $0x3d8] sm:$0xff]  ;;  %v1011_v55 = vpack.c.bf16 %v180_v47, %v176_v46  ;;  %v1139_v56 = vpack.c.bf16 %v182_v50, %v178_v48  ;;  %v184_v58 = vld [vmem:[#allocation5 + $0x3c0] sm:$0xff] }
  0x61   :  { %1120 = vmatpush1.bf16.msra.mxu1 %v1119_v59  ;;  %994 = vmatprep.subr.bf16.mxu0 %v993_v60  ;;  %v191_v54 = vld [vmem:[#allocation5 + $0x3f8] sm:$0xff]  ;;  %v1013_v57 = vpack.c.bf16 %v189_v52, %v185_v51  ;;  %v188_v59 = vld [vmem:[#allocation5 + $0x3e0] sm:$0xff]  ;;  %v186_v60 = vld [vmem:[#allocation5 + $0x3d0] sm:$0xff] }
  0x62   :  { %1122 = vmatprep.subr.bf16.mxu1 %v1121_v0  ;;  %v1141_v61 = vpack.c.bf16 %v191_v54, %v187_v53  ;;  %v190_v62 = vld [vmem:[#allocation5 + $0x3f0] sm:$0xff]  ;;  %v193_v63 = vld [vmem:[#allocation5 + $0x408] sm:$0xff]  ;;  %v195_v1 = vld [vmem:[#allocation5 + $0x418] sm:$0xff]  ;;  %v1015_v3 = vpack.c.bf16 %v188_v59, %v184_v58 }
  0x63   :  { %v197_v0 = vld [vmem:[#allocation5 + $0x428] sm:$0xff]  ;;  %v199_v2 = vld [vmem:[#allocation5 + $0x438] sm:$0xff]  ;;  %v1143_v4 = vpack.c.bf16 %v190_v62, %v186_v60  ;;  %v196_v7 = vld [vmem:[#allocation5 + $0x420] sm:$0xff] }
  0x64   :  { %996 = vmatpush1.bf16.msra.mxu0 %v995_v6  ;;  %v1017_v5 = vpack.c.bf16 %v197_v0, %v193_v63  ;;  %v192_v6 = vld [vmem:[#allocation5 + $0x400] sm:$0xff]  ;;  %v198_v10 = vld [vmem:[#allocation5 + $0x430] sm:$0xff]  ;;  %v201_v11 = vld [vmem:[#allocation5 + $0x448] sm:$0xff] }
  0x65   :  { %1124 = vmatpush1.bf16.msra.mxu1 %v1123_v8  ;;  %998 = vmatprep.subr.bf16.mxu0 %v997_v9  ;;  %v194_v8 = vld [vmem:[#allocation5 + $0x410] sm:$0xff]  ;;  %v1145_v9 = vpack.c.bf16 %v199_v2, %v195_v1  ;;  %v205_v12 = vld [vmem:[#allocation5 + $0x468] sm:$0xff]  ;;  %v207_v14 = vld [vmem:[#allocation5 + $0x478] sm:$0xff]  ;;  %v1019_v16 = vpack.c.bf16 %v196_v7, %v192_v6 }
  0x66   :  { %1126 = vmatprep.subr.bf16.mxu1 %v1125_v13  ;;  %v203_v13 = vld [vmem:[#allocation5 + $0x458] sm:$0xff]  ;;  %v60_v15 = vld [vmem:[#allocation2] sm:$0xff]  ;;  %v1147_v17 = vpack.c.bf16 %v198_v10, %v194_v8  ;;  %v1021_v18 = vpack.c.bf16 %v205_v12, %v201_v11  ;;  %v206_v23 = vld [vmem:[#allocation5 + $0x470] sm:$0xff] }
  0x67   :  { %v1149_v22 = vpack.c.bf16 %v207_v14, %v203_v13  ;;  %v209_v24 = vld [vmem:[#allocation5 + $0x488] sm:$0xff]  ;;  %v211_v26 = vld [vmem:[#allocation5 + $0x498] sm:$0xff]  ;;  %v214_v35 = vld [vmem:[#allocation5 + $0x4b0] sm:$0xff] }
  0x68   :  { %1000 = vmatpush1.bf16.msra.mxu0 %v999_v19  ;;  %v200_v19 = vld [vmem:[#allocation5 + $0x440] sm:$0xff]  ;;  %v215_v27 = vld [vmem:[#allocation5 + $0x4b8] sm:$0xff]  ;;  %v217_v36 = vld [vmem:[#allocation5 + $0x4c8] sm:$0xff] }
  0x69   :  { %1128 = vmatpush1.bf16.msra.mxu1 %v1127_v20  ;;  %1002 = vmatprep.subr.bf16.mxu0 %v1001_v21  ;;  %v204_v20 = vld [vmem:[#allocation5 + $0x460] sm:$0xff]  ;;  %v202_v21 = vld [vmem:[#allocation5 + $0x450] sm:$0xff]  ;;  %v1153_v34 = vpack.c.bf16 %v215_v27, %v211_v26  ;;  %v219_v38 = vld [vmem:[#allocation5 + $0x4d8] sm:$0xff] }
  0x6a   :  { %1130 = vmatprep.subr.bf16.mxu1 %v1129_v25  ;;  %v213_v25 = vld [vmem:[#allocation5 + $0x4a8] sm:$0xff]  ;;  %v1023_v28 = vpack.c.bf16 %v204_v20, %v200_v19  ;;  %v1151_v29 = vpack.c.bf16 %v206_v23, %v202_v21  ;;  %v223_v39 = vld [vmem:[#allocation5 + $0x4f8] sm:$0xff]  ;;  %v222_v47 = vld [vmem:[#allocation5 + $0x4f0] sm:$0xff] }
  0x6b   :  { %v1025_v30 = vpack.c.bf16 %v213_v25, %v209_v24  ;;  %v1157_v46 = vpack.c.bf16 %v223_v39, %v219_v38  ;;  %v225_v48 = vld [vmem:[#allocation5 + $0x508] sm:$0xff]  ;;  %v227_v50 = vld [vmem:[#allocation5 + $0x518] sm:$0xff]  ;;  %v230_v59 = vld [vmem:[#allocation5 + $0x530] sm:$0xff] }
  0x6c   :  { %1004 = vmatpush1.bf16.msra.mxu0 %v1003_v31  ;;  %v208_v31 = vld [vmem:[#allocation5 + $0x480] sm:$0xff]  ;;  %v231_v51 = vld [vmem:[#allocation5 + $0x538] sm:$0xff]  ;;  %v233_v60 = vld [vmem:[#allocation5 + $0x548] sm:$0xff] }
  0x6d   :  { %1132 = vmatpush1.bf16.msra.mxu1 %v1131_v32  ;;  %1006 = vmatprep.subr.bf16.mxu0 %v1005_v33  ;;  %v212_v32 = vld [vmem:[#allocation5 + $0x4a0] sm:$0xff]  ;;  %v210_v33 = vld [vmem:[#allocation5 + $0x490] sm:$0xff]  ;;  %v1161_v58 = vpack.c.bf16 %v231_v51, %v227_v50  ;;  %v235_v62 = vld [vmem:[#allocation5 + $0x558] sm:$0xff] }
  0x6e   :  { %1134 = vmatprep.subr.bf16.mxu1 %v1133_v37  ;;  %v221_v37 = vld [vmem:[#allocation5 + $0x4e8] sm:$0xff]  ;;  %v1027_v40 = vpack.c.bf16 %v212_v32, %v208_v31  ;;  %v1155_v41 = vpack.c.bf16 %v214_v35, %v210_v33  ;;  %v239_v63 = vld [vmem:[#allocation5 + $0x578] sm:$0xff]  ;;  %v238_v7 = vld [vmem:[#allocation5 + $0x570] sm:$0xff] }
  0x6f   :  { %v1029_v42 = vpack.c.bf16 %v221_v37, %v217_v36  ;;  %v1165_v6 = vpack.c.bf16 %v239_v63, %v235_v62  ;;  %v241_v8 = vld [vmem:[#allocation5 + $0x588] sm:$0xff]  ;;  %v243_v10 = vld [vmem:[#allocation5 + $0x598] sm:$0xff]  ;;  %v240_v13 = vld [vmem:[#allocation5 + $0x580] sm:$0xff] }
  0x70   :  { %1008 = vmatpush1.bf16.msra.mxu0 %v1007_v43  ;;  %v216_v43 = vld [vmem:[#allocation5 + $0x4c0] sm:$0xff]  ;;  %v247_v11 = vld [vmem:[#allocation5 + $0x5b8] sm:$0xff]  ;;  %v249_v20 = vld [vmem:[#allocation5 + $0x5c8] sm:$0xff] }
  0x71   :  { %1136 = vmatpush1.bf16.msra.mxu1 %v1135_v44  ;;  %1010 = vmatprep.subr.bf16.mxu0 %v1009_v45  ;;  %v220_v44 = vld [vmem:[#allocation5 + $0x4e0] sm:$0xff]  ;;  %v218_v45 = vld [vmem:[#allocation5 + $0x4d0] sm:$0xff]  ;;  %v1169_v19 = vpack.c.bf16 %v247_v11, %v243_v10  ;;  %v253_v21 = vld [vmem:[#allocation5 + $0x5e8] sm:$0xff] }
  0x72   :  { %1138 = vmatprep.subr.bf16.mxu1 %v1137_v49  ;;  %v229_v49 = vld [vmem:[#allocation5 + $0x528] sm:$0xff]  ;;  %v1031_v52 = vpack.c.bf16 %v220_v44, %v216_v43  ;;  %v1159_v53 = vpack.c.bf16 %v222_v47, %v218_v45  ;;  %v251_v23 = vld [vmem:[#allocation5 + $0x5d8] sm:$0xff]  ;;  %v1045_v27 = vpack.c.bf16 %v253_v21, %v249_v20  ;;  %v254_v32 = vld [vmem:[#allocation5 + $0x5f0] sm:$0xff] }
  0x73   :  { %v1033_v54 = vpack.c.bf16 %v229_v49, %v225_v48  ;;  %v255_v24 = vld [vmem:[#allocation5 + $0x5f8] sm:$0xff]  ;;  %v257_v33 = vld [vmem:[#allocation5 + $0x608] sm:$0xff]  ;;  %v262_v44 = vld [vmem:[#allocation5 + $0x630] sm:$0xff] }
  0x74   :  { %1012 = vmatpush1.bf16.msra.mxu0 %v1011_v55  ;;  %v224_v55 = vld [vmem:[#allocation5 + $0x500] sm:$0xff]  ;;  %v1173_v31 = vpack.c.bf16 %v255_v24, %v251_v23  ;;  %v259_v35 = vld [vmem:[#allocation5 + $0x618] sm:$0xff]  ;;  %v265_v45 = vld [vmem:[#allocation5 + $0x648] sm:$0xff] }
  0x75   :  { %1140 = vmatpush1.bf16.msra.mxu1 %v1139_v56  ;;  %1014 = vmatprep.subr.bf16.mxu0 %v1013_v57  ;;  %v228_v56 = vld [vmem:[#allocation5 + $0x520] sm:$0xff]  ;;  %v226_v57 = vld [vmem:[#allocation5 + $0x510] sm:$0xff]  ;;  %v263_v36 = vld [vmem:[#allocation5 + $0x638] sm:$0xff] }
  0x76   :  { %1142 = vmatprep.subr.bf16.mxu1 %v1141_v61  ;;  %v237_v61 = vld [vmem:[#allocation5 + $0x568] sm:$0xff]  ;;  %v1035_v0 = vpack.c.bf16 %v228_v56, %v224_v55  ;;  %v1163_v1 = vpack.c.bf16 %v230_v59, %v226_v57  ;;  %v1177_v43 = vpack.c.bf16 %v263_v36, %v259_v35  ;;  %v267_v47 = vld [vmem:[#allocation5 + $0x658] sm:$0xff]  ;;  %v270_v56 = vld [vmem:[#allocation5 + $0x670] sm:$0xff] }
  0x77   :  { %v1037_v2 = vpack.c.bf16 %v237_v61, %v233_v60  ;;  %v271_v48 = vld [vmem:[#allocation5 + $0x678] sm:$0xff]  ;;  %v273_v57 = vld [vmem:[#allocation5 + $0x688] sm:$0xff]  ;;  %v288_v24 = vld [vmem:[#allocation5 + $0x700] sm:$0xff] }
  0x78   :  { %1016 = vmatpush1.bf16.msra.mxu0 %v1015_v3  ;;  %v232_v3 = vld [vmem:[#allocation5 + $0x540] sm:$0xff]  ;;  %v1181_v55 = vpack.c.bf16 %v271_v48, %v267_v47  ;;  %v275_v59 = vld [vmem:[#allocation5 + $0x698] sm:$0xff] }
  0x79   :  { %1144 = vmatpush1.bf16.msra.mxu1 %v1143_v4  ;;  %1018 = vmatprep.subr.bf16.mxu0 %v1017_v5  ;;  %v236_v4 = vld [vmem:[#allocation5 + $0x560] sm:$0xff]  ;;  %v234_v5 = vld [vmem:[#allocation5 + $0x550] sm:$0xff]  ;;  %v279_v60 = vld [vmem:[#allocation5 + $0x6b8] sm:$0xff] }
  0x7a   :  { %1146 = vmatprep.subr.bf16.mxu1 %v1145_v9  ;;  %v245_v9 = vld [vmem:[#allocation5 + $0x5a8] sm:$0xff]  ;;  %v1039_v12 = vpack.c.bf16 %v236_v4, %v232_v3  ;;  %v1167_v14 = vpack.c.bf16 %v238_v7, %v234_v5  ;;  %v1185_v3 = vpack.c.bf16 %v279_v60, %v275_v59  ;;  %v278_v4 = vld [vmem:[#allocation5 + $0x6b0] sm:$0xff]  ;;  %v283_v7 = vld [vmem:[#allocation5 + $0x6d8] sm:$0xff] }
  0x7b   :  { %407 = vmatmul.mubr.f32.vlgmr.msra.gmra.mrb[0].mxu0 %v60_v15  ;;  %v281_v5 = vld [vmem:[#allocation5 + $0x6c8] sm:$0xff]  ;;  %v295_v20 = vld [vmem:[#allocation5 + $0x738] sm:$0xff]  ;;  %v296_v36 = vld [vmem:[#allocation5 + $0x740] sm:$0xff] }
  0x7c   :  { %1020 = vmatpush1.bf16.msra.mxu0 %v1019_v16  ;;  %549 = vmatmul.mubr.f32.vlgmr.msra.gmra.mrb[0].mxu1 %v60_v15  ;;  %v1041_v15 = vpack.c.bf16 %v245_v9, %v241_v8  ;;  %v244_v16 = vld [vmem:[#allocation5 + $0x5a0] sm:$0xff]  ;;  %v287_v8 = vld [vmem:[#allocation5 + $0x6f8] sm:$0xff] }
  0x7d   :  { %1148 = vmatpush1.bf16.msra.mxu1 %v1147_v17  ;;  %1022 = vmatprep.subr.bf16.mxu0 %v1021_v18  ;;  %v242_v17 = vld [vmem:[#allocation5 + $0x590] sm:$0xff]  ;;  %v1043_v25 = vpack.c.bf16 %v244_v16, %v240_v13  ;;  %v284_v13 = vld [vmem:[#allocation5 + $0x6e0] sm:$0xff] }
  0x7e   :  { %1150 = vmatprep.subr.bf16.mxu1 %v1149_v22  ;;  %v246_v18 = vld [vmem:[#allocation5 + $0x5b0] sm:$0xff]  ;;  %v63_v22 = vld [vmem:[#allocation2 + $0x18] sm:$0xff]  ;;  %v304_v48 = vld [vmem:[#allocation5 + $0x780] sm:$0xff] }
  0x7f   :  { %477 = vmatprep.mubr.f32.mxu0 %v63_v22  ;;  %619 = vmatprep.mubr.f32.mxu1 %v63_v22  ;;  %v1171_v26 = vpack.c.bf16 %v246_v18, %v242_v17  ;;  %v286_v16 = vld [vmem:[#allocation5 + $0x6f0] sm:$0xff]  ;;  %v289_v17 = vld [vmem:[#allocation5 + $0x708] sm:$0xff]  ;;  %v312_v60 = vld [vmem:[#allocation5 + $0x7c0] sm:$0xff] }
  0x80   :  { %1024 = vmatpush1.bf16.msra.mxu0 %v1023_v28  ;;  %v248_v28 = vld [vmem:[#allocation5 + $0x5c0] sm:$0xff]  ;;  %v293_v18 = vld [vmem:[#allocation5 + $0x728] sm:$0xff] }
  0x81   :  { %1152 = vmatpush1.bf16.msra.mxu1 %v1151_v29  ;;  %1026 = vmatprep.subr.bf16.mxu0 %v1025_v30  ;;  %v252_v29 = vld [vmem:[#allocation5 + $0x5e0] sm:$0xff]  ;;  %v250_v30 = vld [vmem:[#allocation5 + $0x5d0] sm:$0xff]  ;;  %v1065_v23 = vpack.c.bf16 %v293_v18, %v289_v17  ;;  %v669_v17 = vld [vmem:[#allocation7 + $0x98] sm:$0xff] }
  0x82   :  { %1154 = vmatprep.subr.bf16.mxu1 %v1153_v34  ;;  %v261_v34 = vld [vmem:[#allocation5 + $0x628] sm:$0xff]  ;;  %v1047_v37 = vpack.c.bf16 %v252_v29, %v248_v28  ;;  %v1175_v38 = vpack.c.bf16 %v254_v32, %v250_v30  ;;  %v294_v28 = vld [vmem:[#allocation5 + $0x730] sm:$0xff]  ;;  %v303_v32 = vld [vmem:[#allocation5 + $0x778] sm:$0xff] }
  0x83   :  { %v1049_v39 = vpack.c.bf16 %v261_v34, %v257_v33  ;;  %v297_v29 = vld [vmem:[#allocation5 + $0x748] sm:$0xff]  ;;  %v700_v18 = vld [vmem:[#allocation7 + $0x190] sm:$0xff] }
  0x84   :  { %1028 = vmatpush1.bf16.msra.mxu0 %v1027_v40  ;;  %v256_v40 = vld [vmem:[#allocation5 + $0x600] sm:$0xff]  ;;  %v301_v30 = vld [vmem:[#allocation5 + $0x768] sm:$0xff] }
  0x85   :  { %1156 = vmatpush1.bf16.msra.mxu1 %v1155_v41  ;;  %1030 = vmatprep.subr.bf16.mxu0 %v1029_v42  ;;  %v260_v41 = vld [vmem:[#allocation5 + $0x620] sm:$0xff]  ;;  %v258_v42 = vld [vmem:[#allocation5 + $0x610] sm:$0xff]  ;;  %v1069_v35 = vpack.c.bf16 %v301_v30, %v297_v29  ;;  %v671_v29 = vld [vmem:[#allocation7 + $0xa8] sm:$0xff] }
  0x86   :  { %1158 = vmatprep.subr.bf16.mxu1 %v1157_v46  ;;  %v269_v46 = vld [vmem:[#allocation5 + $0x668] sm:$0xff]  ;;  %v1051_v49 = vpack.c.bf16 %v260_v41, %v256_v40  ;;  %v1179_v50 = vpack.c.bf16 %v262_v44, %v258_v42  ;;  %v302_v40 = vld [vmem:[#allocation5 + $0x770] sm:$0xff]  ;;  %v311_v44 = vld [vmem:[#allocation5 + $0x7b8] sm:$0xff] }
  0x87   :  { %v1053_v51 = vpack.c.bf16 %v269_v46, %v265_v45  ;;  %v305_v41 = vld [vmem:[#allocation5 + $0x788] sm:$0xff]  ;;  %v702_v30 = vld [vmem:[#allocation7 + $0x1a0] sm:$0xff] }
  0x88   :  { %1032 = vmatpush1.bf16.msra.mxu0 %v1031_v52  ;;  %v264_v52 = vld [vmem:[#allocation5 + $0x640] sm:$0xff]  ;;  %v309_v42 = vld [vmem:[#allocation5 + $0x7a8] sm:$0xff] }
  0x89   :  { %1160 = vmatpush1.bf16.msra.mxu1 %v1159_v53  ;;  %1034 = vmatprep.subr.bf16.mxu0 %v1033_v54  ;;  %v268_v53 = vld [vmem:[#allocation5 + $0x660] sm:$0xff]  ;;  %v266_v54 = vld [vmem:[#allocation5 + $0x650] sm:$0xff]  ;;  %v1073_v47 = vpack.c.bf16 %v309_v42, %v305_v41  ;;  %v673_v41 = vld [vmem:[#allocation7 + $0xb8] sm:$0xff] }
  0x8a   :  { %1162 = vmatprep.subr.bf16.mxu1 %v1161_v58  ;;  %v277_v58 = vld [vmem:[#allocation5 + $0x6a8] sm:$0xff]  ;;  %v1055_v61 = vpack.c.bf16 %v268_v53, %v264_v52  ;;  %v1183_v62 = vpack.c.bf16 %v270_v56, %v266_v54  ;;  %v310_v52 = vld [vmem:[#allocation5 + $0x7b0] sm:$0xff]  ;;  %v319_v56 = vld [vmem:[#allocation5 + $0x7f8] sm:$0xff] }
  0x8b   :  { %v1057_v63 = vpack.c.bf16 %v277_v58, %v273_v57  ;;  %v313_v53 = vld [vmem:[#allocation5 + $0x7c8] sm:$0xff]  ;;  %v704_v42 = vld [vmem:[#allocation7 + $0x1b0] sm:$0xff] }
  0x8c   :  { %1036 = vmatpush1.bf16.msra.mxu0 %v1035_v0  ;;  %v272_v0 = vld [vmem:[#allocation5 + $0x680] sm:$0xff]  ;;  %v317_v54 = vld [vmem:[#allocation5 + $0x7e8] sm:$0xff] }
  0x8d   :  { %1164 = vmatpush1.bf16.msra.mxu1 %v1163_v1  ;;  %1038 = vmatprep.subr.bf16.mxu0 %v1037_v2  ;;  %v276_v1 = vld [vmem:[#allocation5 + $0x6a0] sm:$0xff]  ;;  %v274_v2 = vld [vmem:[#allocation5 + $0x690] sm:$0xff]  ;;  %v1077_v59 = vpack.c.bf16 %v317_v54, %v313_v53  ;;  %v675_v53 = vld [vmem:[#allocation7 + $0xc8] sm:$0xff] }
  0x8e   :  { %1166 = vmatprep.subr.bf16.mxu1 %v1165_v6  ;;  %v285_v6 = vld [vmem:[#allocation5 + $0x6e8] sm:$0xff]  ;;  %v1059_v9 = vpack.c.bf16 %v276_v1, %v272_v0  ;;  %v1187_v10 = vpack.c.bf16 %v278_v4, %v274_v2  ;;  %v318_v0 = vld [vmem:[#allocation5 + $0x7f0] sm:$0xff]  ;;  %v666_v1 = vld [vmem:[#allocation7 + $0x80] sm:$0xff] }
  0x8f   :  { %v1061_v11 = vpack.c.bf16 %v285_v6, %v281_v5  ;;  %v667_v2 = vld [vmem:[#allocation7 + $0x88] sm:$0xff]  ;;  %v706_v54 = vld [vmem:[#allocation7 + $0x1c0] sm:$0xff] }
  0x90   :  { %1040 = vmatpush1.bf16.msra.mxu0 %v1039_v12  ;;  %v280_v12 = vld [vmem:[#allocation5 + $0x6c0] sm:$0xff]  ;;  %v699_v4 = vld [vmem:[#allocation7 + $0x188] sm:$0xff] }
  0x91   :  { %1168 = vmatpush1.bf16.msra.mxu1 %v1167_v14  ;;  %1042 = vmatprep.subr.bf16.mxu0 %v1041_v15  ;;  %v282_v14 = vld [vmem:[#allocation5 + $0x6d0] sm:$0xff]  ;;  %v1189_v15 = vpack.c.bf16 %v287_v8, %v283_v7  ;;  %v1063_v21 = vpack.c.bf16 %v284_v13, %v280_v12  ;;  %v1209_v7 = vpack.c.bf16 %v667_v2, %v666_v1  ;;  %v682_v12 = vld [vmem:[#allocation7 + $0x100] sm:$0xff]  ;;  %v677_v1 = vld [vmem:[#allocation7 + $0xd8] sm:$0xff] }
  0x92   :  { %1170 = vmatprep.subr.bf16.mxu1 %v1169_v19  ;;  %v291_v19 = vld [vmem:[#allocation5 + $0x718] sm:$0xff]  ;;  %v1191_v22 = vpack.c.bf16 %v286_v16, %v282_v14  ;;  %v683_v14 = vld [vmem:[#allocation7 + $0x108] sm:$0xff]  ;;  %v668_v16 = vld [vmem:[#allocation7 + $0x90] sm:$0xff] }
  0x93   :  { %v708_v2 = vld [vmem:[#allocation7 + $0x1d0] sm:$0xff] }
  0x94   :  { %1044 = vmatpush1.bf16.msra.mxu0 %v1043_v25  ;;  %v292_v25 = vld [vmem:[#allocation5 + $0x720] sm:$0xff] }
  0x95   :  { %1172 = vmatpush1.bf16.msra.mxu1 %v1171_v26  ;;  %1046 = vmatprep.subr.bf16.mxu0 %v1045_v27  ;;  %v290_v26 = vld [vmem:[#allocation5 + $0x710] sm:$0xff]  ;;  %v1193_v27 = vpack.c.bf16 %v295_v20, %v291_v19  ;;  %v1067_v33 = vpack.c.bf16 %v292_v25, %v288_v24  ;;  %v1213_v19 = vpack.c.bf16 %v669_v17, %v668_v16  ;;  %v701_v20 = vld [vmem:[#allocation7 + $0x198] sm:$0xff]  ;;  %v711_v16 = vld [vmem:[#allocation7 + $0x1e8] sm:$0xff] }
  0x96   :  { %1174 = vmatprep.subr.bf16.mxu1 %v1173_v31  ;;  %v299_v31 = vld [vmem:[#allocation5 + $0x758] sm:$0xff]  ;;  %v1195_v34 = vpack.c.bf16 %v294_v28, %v290_v26  ;;  %v684_v25 = vld [vmem:[#allocation7 + $0x110] sm:$0xff]  ;;  %v670_v28 = vld [vmem:[#allocation7 + $0xa0] sm:$0xff] }
  0x97   :  { %v685_v26 = vld [vmem:[#allocation7 + $0x118] sm:$0xff]  ;;  %v662_v17 = vld [vmem:[#allocation7 + $0x60] sm:$0xff] }
  0x98   :  { %1048 = vmatpush1.bf16.msra.mxu0 %v1047_v37  ;;  %v300_v37 = vld [vmem:[#allocation5 + $0x760] sm:$0xff] }
  0x99   :  { %1176 = vmatpush1.bf16.msra.mxu1 %v1175_v38  ;;  %1050 = vmatprep.subr.bf16.mxu0 %v1049_v39  ;;  %v298_v38 = vld [vmem:[#allocation5 + $0x750] sm:$0xff]  ;;  %v1197_v39 = vpack.c.bf16 %v303_v32, %v299_v31  ;;  %v1071_v45 = vpack.c.bf16 %v300_v37, %v296_v36  ;;  %v1217_v31 = vpack.c.bf16 %v671_v29, %v670_v28  ;;  %v703_v32 = vld [vmem:[#allocation7 + $0x1a8] sm:$0xff]  ;;  %v686_v37 = vld [vmem:[#allocation7 + $0x120] sm:$0xff] }
  0x9a   :  { %1178 = vmatprep.subr.bf16.mxu1 %v1177_v43  ;;  %v307_v43 = vld [vmem:[#allocation5 + $0x798] sm:$0xff]  ;;  %v1199_v46 = vpack.c.bf16 %v302_v40, %v298_v38  ;;  %v687_v38 = vld [vmem:[#allocation7 + $0x128] sm:$0xff]  ;;  %v672_v40 = vld [vmem:[#allocation7 + $0xb0] sm:$0xff] }
  0x9c   :  { %1052 = vmatpush1.bf16.msra.mxu0 %v1051_v49  ;;  %v308_v49 = vld [vmem:[#allocation5 + $0x7a0] sm:$0xff] }
  0x9d   :  { %1180 = vmatpush1.bf16.msra.mxu1 %v1179_v50  ;;  %1054 = vmatprep.subr.bf16.mxu0 %v1053_v51  ;;  %v306_v50 = vld [vmem:[#allocation5 + $0x790] sm:$0xff]  ;;  %v1201_v51 = vpack.c.bf16 %v311_v44, %v307_v43  ;;  %v1075_v57 = vpack.c.bf16 %v308_v49, %v304_v48  ;;  %v1221_v43 = vpack.c.bf16 %v673_v41, %v672_v40  ;;  %v705_v44 = vld [vmem:[#allocation7 + $0x1b8] sm:$0xff] }
  0x9e   :  { %1182 = vmatprep.subr.bf16.mxu1 %v1181_v55  ;;  %v315_v55 = vld [vmem:[#allocation5 + $0x7d8] sm:$0xff]  ;;  %v1203_v58 = vpack.c.bf16 %v310_v52, %v306_v50  ;;  %v688_v49 = vld [vmem:[#allocation7 + $0x130] sm:$0xff]  ;;  %v674_v52 = vld [vmem:[#allocation7 + $0xc0] sm:$0xff] }
  0x9f   :  { %v689_v50 = vld [vmem:[#allocation7 + $0x138] sm:$0xff] }
  0xa0   :  { %1056 = vmatpush1.bf16.msra.mxu0 %v1055_v61  ;;  %v316_v61 = vld [vmem:[#allocation5 + $0x7e0] sm:$0xff] }
  0xa1   :  { %1184 = vmatpush1.bf16.msra.mxu1 %v1183_v62  ;;  %1058 = vmatprep.subr.bf16.mxu0 %v1057_v63  ;;  %v314_v62 = vld [vmem:[#allocation5 + $0x7d0] sm:$0xff]  ;;  %v1205_v63 = vpack.c.bf16 %v319_v56, %v315_v55  ;;  %v1079_v5 = vpack.c.bf16 %v316_v61, %v312_v60  ;;  %v1225_v55 = vpack.c.bf16 %v675_v53, %v674_v52  ;;  %v707_v56 = vld [vmem:[#allocation7 + $0x1c8] sm:$0xff]  ;;  %v690_v61 = vld [vmem:[#allocation7 + $0x140] sm:$0xff] }
  0xa2   :  { %1186 = vmatprep.subr.bf16.mxu1 %v1185_v3  ;;  %v698_v3 = vld [vmem:[#allocation7 + $0x180] sm:$0xff]  ;;  %v1207_v6 = vpack.c.bf16 %v318_v0, %v314_v62  ;;  %v691_v62 = vld [vmem:[#allocation7 + $0x148] sm:$0xff]  ;;  %v676_v0 = vld [vmem:[#allocation7 + $0xd0] sm:$0xff] }
  0xa3   :  { %v1241_v8 = vpack.c.bf16 %v699_v4, %v698_v3  ;;  %v1229_v3 = vpack.c.bf16 %v677_v1, %v676_v0  ;;  %v709_v4 = vld [vmem:[#allocation7 + $0x1d8] sm:$0xff] }
  0xa4   :  { %1060 = vmatpush1.bf16.msra.mxu0 %v1059_v9  ;;  %v62_v9 = vld [vmem:[#allocation2 + $0x10] sm:$0xff] }
  0xa5   :  { %1188 = vmatpush1.bf16.msra.mxu1 %v1187_v10  ;;  %1062 = vmatprep.subr.bf16.mxu0 %v1061_v11  ;;  %v650_v10 = vld [vmem:[#allocation7] sm:$0xff]  ;;  %v651_v11 = vld [vmem:[#allocation7 + $0x8] sm:$0xff] }
  0xa6   :  { %1190 = vmatprep.subr.bf16.mxu1 %v1189_v15  ;;  %v1211_v13 = vpack.c.bf16 %v651_v11, %v650_v10  ;;  %v1243_v15 = vpack.c.bf16 %v683_v14, %v682_v12  ;;  %v693_v10 = vld [vmem:[#allocation7 + $0x158] sm:$0xff]  ;;  %v678_v12 = vld [vmem:[#allocation7 + $0xe0] sm:$0xff] }
  0xa7   :  { %v710_v14 = vld [vmem:[#allocation7 + $0x1e0] sm:$0xff] }
  0xa8   :  { %1064 = vmatpush1.bf16.msra.mxu0 %v1063_v21  ;;  %v652_v21 = vld [vmem:[#allocation7 + $0x10] sm:$0xff] }
  0xa9   :  { %1192 = vmatpush1.bf16.msra.mxu1 %v1191_v22  ;;  %1066 = vmatprep.subr.bf16.mxu0 %v1065_v23  ;;  %v653_v22 = vld [vmem:[#allocation7 + $0x18] sm:$0xff]  ;;  %v1245_v23 = vpack.c.bf16 %v701_v20, %v700_v18  ;;  %v663_v18 = vld [vmem:[#allocation7 + $0x68] sm:$0xff] }
  0xaa   :  { %1194 = vmatprep.subr.bf16.mxu1 %v1193_v27  ;;  %v1215_v24 = vpack.c.bf16 %v653_v22, %v652_v21  ;;  %v1247_v27 = vpack.c.bf16 %v685_v26, %v684_v25  ;;  %v1235_v20 = vpack.c.bf16 %v663_v18, %v662_v17  ;;  %v694_v21 = vld [vmem:[#allocation7 + $0x160] sm:$0xff]  ;;  %v695_v22 = vld [vmem:[#allocation7 + $0x168] sm:$0xff]  ;;  %v681_v25 = vld [vmem:[#allocation7 + $0xf8] sm:$0xff] }
  0xab   :  { %v712_v26 = vld [vmem:[#allocation7 + $0x1f0] sm:$0xff] }
  0xac   :  { %1068 = vmatpush1.bf16.msra.mxu0 %v1067_v33  ;;  %v654_v33 = vld [vmem:[#allocation7 + $0x20] sm:$0xff] }
  0xad   :  { %1196 = vmatpush1.bf16.msra.mxu1 %v1195_v34  ;;  %1070 = vmatprep.subr.bf16.mxu0 %v1069_v35  ;;  %v655_v34 = vld [vmem:[#allocation7 + $0x28] sm:$0xff]  ;;  %v1249_v35 = vpack.c.bf16 %v703_v32, %v702_v30  ;;  %v664_v30 = vld [vmem:[#allocation7 + $0x70] sm:$0xff] }
  0xae   :  { %1198 = vmatprep.subr.bf16.mxu1 %v1197_v39  ;;  %v1219_v36 = vpack.c.bf16 %v655_v34, %v654_v33  ;;  %v1251_v39 = vpack.c.bf16 %v687_v38, %v686_v37  ;;  %v696_v32 = vld [vmem:[#allocation7 + $0x170] sm:$0xff]  ;;  %v697_v34 = vld [vmem:[#allocation7 + $0x178] sm:$0xff] }
  0xb0   :  { %1072 = vmatpush1.bf16.msra.mxu0 %v1071_v45  ;;  %v656_v45 = vld [vmem:[#allocation7 + $0x30] sm:$0xff] }
  0xb1   :  { %1200 = vmatpush1.bf16.msra.mxu1 %v1199_v46  ;;  %1074 = vmatprep.subr.bf16.mxu0 %v1073_v47  ;;  %v657_v46 = vld [vmem:[#allocation7 + $0x38] sm:$0xff]  ;;  %v1253_v47 = vpack.c.bf16 %v705_v44, %v704_v42 }
  0xb2   :  { %1202 = vmatprep.subr.bf16.mxu1 %v1201_v51  ;;  %v1223_v48 = vpack.c.bf16 %v657_v46, %v656_v45  ;;  %v1255_v51 = vpack.c.bf16 %v689_v50, %v688_v49 }
  0xb4   :  { %1076 = vmatpush1.bf16.msra.mxu0 %v1075_v57  ;;  %v658_v57 = vld [vmem:[#allocation7 + $0x40] sm:$0xff] }
  0xb5   :  { %1204 = vmatpush1.bf16.msra.mxu1 %v1203_v58  ;;  %1078 = vmatprep.subr.bf16.mxu0 %v1077_v59  ;;  %v659_v58 = vld [vmem:[#allocation7 + $0x48] sm:$0xff]  ;;  %v1257_v59 = vpack.c.bf16 %v707_v56, %v706_v54 }
  0xb6   :  { %1206 = vmatprep.subr.bf16.mxu1 %v1205_v63  ;;  %v1227_v60 = vpack.c.bf16 %v659_v58, %v658_v57  ;;  %v1259_v63 = vpack.c.bf16 %v691_v62, %v690_v61 }
  0xb8   :  { %1080 = vmatpush1.bf16.msra.mxu0 %v1079_v5  ;;  %v660_v5 = vld [vmem:[#allocation7 + $0x50] sm:$0xff] }
  0xb9   :  { %1208 = vmatpush1.bf16.msra.mxu1 %v1207_v6  ;;  %1210 = vmatprep.subr.bf16.mxu0 %v1209_v7  ;;  %v661_v6 = vld [vmem:[#allocation7 + $0x58] sm:$0xff]  ;;  %v1261_v7 = vpack.c.bf16 %v709_v4, %v708_v2 }
  0xba   :  { %1242 = vmatprep.subr.bf16.mxu1 %v1241_v8  ;;  %v1231_v8 = vpack.c.bf16 %v661_v6, %v660_v5 }
  0xbb   :  { %478 = vmatmul.mubr.f32.vlgmr.msra.gmra.mrb[0].mxu0 %v62_v9 }
  0xbc   :  { %620 = vmatmul.mubr.f32.vlgmr.msra.gmra.mrb[0].mxu1 %v62_v9  ;;  %1212 = vmatpush3.bf16.msra.mxu0 %v1211_v13  ;;  %v692_v9 = vld [vmem:[#allocation7 + $0x150] sm:$0xff]  ;;  %v679_v13 = vld [vmem:[#allocation7 + $0xe8] sm:$0xff] }
  0xbd   :  { %1244 = vmatpush3.bf16.msra.mxu1 %v1243_v15  ;;  %1214 = vmatprep.subr.bf16.mxu0 %v1213_v19  ;;  %v1263_v11 = vpack.c.bf16 %v693_v10, %v692_v9  ;;  %v1233_v15 = vpack.c.bf16 %v679_v13, %v678_v12  ;;  %v1265_v19 = vpack.c.bf16 %v711_v16, %v710_v14  ;;  %v882_v9 = vld [vmem:[%s1495_s4] ss:$0 sm:$0xff] }
  0xbe   :  { %1246 = vmatprep.subr.bf16.mxu1 %v1245_v23  ;;  %v680_v23 = vld [vmem:[#allocation7 + $0xf0] sm:$0xff] }
  0xbf   :  { %v1237_v28 = vpack.c.bf16 %v681_v25, %v680_v23 }
  0xc0   :  { %1216 = vmatpush3.bf16.msra.mxu0 %v1215_v24  ;;  %v1267_v24 = vpack.c.bf16 %v695_v22, %v694_v21 }
  0xc1   :  { %1248 = vmatpush3.bf16.msra.mxu1 %v1247_v27  ;;  %1218 = vmatprep.subr.bf16.mxu0 %v1217_v31  ;;  %v713_v27 = vld [vmem:[#allocation7 + $0x1f8] sm:$0xff] }
  0xc2   :  { %1250 = vmatprep.subr.bf16.mxu1 %v1249_v35  ;;  %v1269_v29 = vpack.c.bf16 %v713_v27, %v712_v26  ;;  %v665_v31 = vld [vmem:[#allocation7 + $0x78] sm:$0xff]  ;;  %v1271_v35 = vpack.c.bf16 %v697_v34, %v696_v32 }
  0xc3   :  { %v1239_v33 = vpack.c.bf16 %v665_v31, %v664_v30 }
  0xc4   :  { %1220 = vmatpush3.bf16.msra.mxu0 %v1219_v36  ;;  %v322_v36 = vlaneseq }
  0xc5   :  { %1252 = vmatpush3.bf16.msra.mxu1 %v1251_v39  ;;  %1222 = vmatprep.subr.bf16.mxu0 %v1221_v43  ;;  %v320_v39 = vld [vmem:[%s1493_s2] sm:$0xf] }
  0xc6   :  { %1254 = vmatprep.subr.bf16.mxu1 %v1253_v47  ;;  %v323_v37 = vshrl.u32 %v322_v36, 7 }
  0xc8   :  { %1224 = vmatpush3.bf16.msra.mxu0 %v1223_v48  ;;  %v324_v38 = vsub.s32 0, %v323_v37  ;;  %v332_v40 = vsub.s32 2, %v323_v37  ;;  %v328_v41 = vsub.s32 1, %v323_v37  ;;  %v336_v42 = vsub.s32 3, %v323_v37 }
  0xc9   :  { %1256 = vmatpush3.bf16.msra.mxu1 %v1255_v51  ;;  %1226 = vmatprep.subr.bf16.mxu0 %v1225_v55 }
  0xca   :  { %1258 = vmatprep.subr.bf16.mxu1 %v1257_v59  ;;  %v325_v43 = vrot.slane %v320_v39, %v324_v38  ;;  %v333_v44 = vrot.slane %v320_v39, %v332_v40  ;;  %v329_v45 = vrot.slane %v320_v39, %v328_v41  ;;  %v337_v46 = vrot.slane %v320_v39, %v336_v42 }
  0xcc   :  { %1228 = vmatpush3.bf16.msra.mxu0 %v1227_v60 }
  0xcd   :  { %1260 = vmatpush3.bf16.msra.mxu1 %v1259_v63  ;;  %1230 = vmatprep.subr.bf16.mxu0 %v1229_v3 }
  0xce   :  { %1262 = vmatprep.subr.bf16.mxu1 %v1261_v7 }
  0xd0   :  { %1232 = vmatpush3.bf16.msra.mxu0 %v1231_v8 }
  0xd1   :  { %1264 = vmatpush3.bf16.msra.mxu1 %v1263_v11  ;;  %1234 = vmatprep.subr.bf16.mxu0 %v1233_v15 }
  0xd2   :  { %1266 = vmatprep.subr.bf16.mxu1 %v1265_v19 }
  0xd4   :  { %1236 = vmatpush3.bf16.msra.mxu0 %v1235_v20 }
  0xd5   :  { %1268 = vmatpush3.bf16.msra.mxu1 %v1267_v24  ;;  %1238 = vmatprep.subr.bf16.mxu0 %v1237_v28 }
  0xd6   :  { %1270 = vmatprep.subr.bf16.mxu1 %v1269_v29 }
  0xd8   :  { %1240 = vmatpush3.bf16.msra.mxu0 %v1239_v33 }
  0xd9   :  { %1272 = vmatpush3.bf16.msra.mxu1 %v1271_v35 }
 0x18e   :  { %v479_v47 = vpop.f32.mrb[0].mxu0 }
 0x18f   :  { %v1273_v48 = vadd.f32 %v479_v47, %v325_v43  ;;  %v621_v49 = vpop.f32.mrb[0].mxu1  ;;  %v481_v50 = vpop.f32.mrb[1].mxu0 }
 0x190   :  { %v1275_v51 = vadd.f32 %v621_v49, %v333_v44  ;;  %v1274_v52 = vadd.f32 %v481_v50, %v329_v45  ;;  %v623_v53 = vpop.f32.mrb[1].mxu1 }
 0x191   :  { %v878_v54 = vmul.f32 -1.442695, %v1273_v48  ;;  %v1276_v55 = vadd.f32 %v623_v53, %v337_v46 }
 0x192   :  { %v880_v56 = vmul.f32 -1.442695, %v1275_v51  ;;  %v879_v57 = vmul.f32 -1.442695, %v1274_v52 }
 0x193   :  { %1289 = vpow2.f32 %v878_v54  ;;  %v881_v58 = vmul.f32 -1.442695, %v1276_v55 }
 0x194   :  { %1291 = vpow2.f32 %v880_v56 }
 0x195   :  { %1293 = vpow2.f32 %v879_v57 }
 0x196   :  { %1295 = vpow2.f32 %v881_v58 }
 0x19d   :  { %v1290_v59 = vpop.eup %1289 }
 0x19e   :  { %v1292_v60 = vpop.eup %1291  ;;  %v638_v61 = vadd.f32 1.0, %v1290_v59 }
 0x19f   :  { %v1294_v62 = vpop.eup %1293  ;;  %v640_v0 = vadd.f32 1.0, %v1292_v60 }
 0x1a0   :  { %v1296_v63 = vpop.eup %1295  ;;  %v639_v1 = vadd.f32 1.0, %v1294_v62  ;;  %1297 = vrcp.f32 %v638_v61 }
 0x1a1   :  { %v641_v2 = vadd.f32 1.0, %v1296_v63 }
 0x1a2   :  { %1299 = vrcp.f32 %v639_v1 }
 0x1a3   :  { %1301 = vrcp.f32 %v641_v2 }
 0x1a4   :  { %1303 = vrcp.f32 %v640_v0 }
 0x1aa   :  { %v1298_v3 = vpop.eup %1297 }
 0x1ac   :  { %v1300_v4 = vpop.eup %1299 }
 0x1ad   :  { %v1302_v5 = vpop.eup %1301  ;;  %785 = vmatprep.mubr.f32.mxu0 %v1300_v4 }
 0x1ae   :  { %v1304_v6 = vpop.eup %1303  ;;  %855 = vmatprep.mubr.f32.mxu1 %v1302_v5  ;;  %786 = vmatmul.mubr.f32.vlgmr.msra.gmra.mrb[2].mxu0 %v1298_v3 }
 0x1af   :  { %856 = vmatmul.mubr.f32.vlgmr.msra.gmra.mrb[2].mxu1 %v1304_v6 }
 0x281   :  { %v915_v7 = vpop.f32.mrb[2].mxu0 }
 0x282   :  { %v950_v8 = vpop.f32.mrb[2].mxu1  ;;  %v916_v10 = vpop.f32.mrb[3].mxu0 }
 0x283   :  { %v917_v11 = vadd.f32 %v916_v10, %v915_v7  ;;  %v951_v12 = vpop.f32.mrb[3].mxu1 }
 0x284   :  { %v952_v13 = vadd.f32 %v951_v12, %v950_v8 }
 0x285   :  { %v788_v14 = vadd.f32 %v917_v11, %v882_v9 }
 0x287   :  { %v858_v15 = vadd.f32 %v952_v13, %v788_v14 }
 0x289   :  { %861 = vst [vmem:[#allocation8] sm:$0xff] %v858_v15 }
 0x28a   :  { %1382 = shalt.err (!%p1379_p0)
}
 0x28b   :  { %s1383_s4 = scalar_lea.hbm %s1496_s5, 128 }
 0x28c   :  { %p1384_p1 = scmp.ne.s32.totalorder %s1496_s5, %s1383_s4  ;;  %p1387_p2 = scmp.lt.u32.totalorder %s1383_s4, %s1496_s5 }
 0x28e   :  { %p1389_p3 = pnand %p1387_p2, %p1384_p1 }
 0x290   :  { %1392 = shalt.err (!%p1389_p3)
}
 0x291   :  { %871 = dma.vmem_to_hbm [thread:$0]  %s869_s9, 128, %s1496_s5, [#allocation4]  }
 0x292   :  { %1397 = dma.done.wait [#allocation4], 128  }
 0x293   :  { %1398 = vsyncadd [#allocation4], 4294967168 }
 0x294   :  { %875 = vsyncpa [#allocation3], 1 }
 0x295   :  { %876 = vsyncpa [#allocation6], 1 }
 0x296   :  { %877 = vsyncpa [#allocation4], 1 }

</bundles_post_ra>
